<compile_context>
chip_gen: v7x
topology: tpu7x:2x2x1
jax: 0.10.0
libtpu: 0.0.40
codegen_flags: <defaults>
</compile_context>

<pallas_src>
import functools
import math

import jax
import jax.numpy as jnp
from jax import lax
from jax.experimental import pallas as pl
from jax.experimental.pallas import tpu as pltpu

THRESHOLD = 2.0  # SpikeModule.threshold


# ---------------------------------------------------------------------------
# small helpers
# ---------------------------------------------------------------------------
def _round_up(x, m):
    return ((x + m - 1) // m) * m


def _choose_group(n_imgs, hw_out):
    """Images handled per grid step.

    Smallest G making the (Cout, G*HW) state/output blocks 128-lane aligned,
    then grown toward >=512-lane tiles while keeping >=4 grid steps (so both
    v7x TensorCores get >=2 pipelined steps).  On single-TC v5e/v6e extra grid
    steps only cost ~0.35us each, so no further splitting is forced.
    """
    g = 128 // math.gcd(hw_out, 128)
    if n_imgs % g != 0:
        # TODO(synk): pad the batch instead of failing for awkward batch sizes.
        raise ValueError(f"batch={n_imgs} must be divisible by {g} "
                         f"(per-image output pixels={hw_out})")
    while (g * hw_out < 512 and n_imgs % (2 * g) == 0
           and n_imgs // (2 * g) >= 4):
        g *= 2
    return g


def _compiler_params(per_step_bytes):
    # real double-buffered footprint + headroom, capped well below the 64 MiB
    # physical VMEM of a v7x TensorCore (no blanket 32 MiB floor).
    vmem = int(min(2 * per_step_bytes + (8 << 20), 48 << 20))
    return pltpu.CompilerParams(dimension_semantics=("parallel",),
                                vmem_limit_bytes=vmem)


# ---------------------------------------------------------------------------
# in-kernel direct conv: KH*KW shifted-slice GEMMs on the flattened image
# ---------------------------------------------------------------------------
def _conv_image(x_ref, w_ref, col, base, *, kh, kw, w_dim, pad, hw, cout):
    """Conv of one H-padded, row-major-flattened image.

    x_ref : (Cin, G*Limg) bf16 window; this image's data starts at lane `base`
            with (pad+1) zero rows above/below the original rows.
    w_ref : (KH*KW, Cout, Cin) bf16 weights.
    col   : (1, hw) int32 output-column index (m mod W) per lane.
    Returns the (Cout, hw) f32 accumulator (bias not added).
    """
    acc = jnp.zeros((cout, hw), jnp.float32)
    for kx in range(kw):
        dc = kx - pad
        part = jnp.zeros((cout, hw), jnp.float32)
        for ky in range(kh):
            off = base + (ky + 1) * w_dim + dc
            xs = x_ref[:, off:off + hw]            # (Cin, hw) shifted slice
            part = part + jnp.dot(w_ref[ky * kw + kx], xs,
                                  preferred_element_type=jnp.float32)
        if dc != 0:
            # zero lanes whose column index wrapped across a row boundary
            valid = jnp.logical_and(col + dc >= 0, col + dc < w_dim)
            part = jnp.where(valid, part, 0.0)
        acc = acc + part
    return acc


# ---------------------------------------------------------------------------
# Pallas kernels
# ---------------------------------------------------------------------------
def _ann_kernel(x_ref, w_ref, b_ref, out_ref, *,
                kh, kw, w_dim, pad, hw, l_img, g_imgs):
    # non-spike branch: StraightThrough(relu) is identity -> conv + bias
    cout = out_ref.shape[0]
    col = lax.broadcasted_iota(jnp.int32, (1, hw), 1) % w_dim
    for g in range(g_imgs):
        acc = _conv_image(x_ref, w_ref, col, g * l_img,
                          kh=kh, kw=kw, w_dim=w_dim, pad=pad, hw=hw, cout=cout)
        out_ref[:, g * hw:(g + 1) * hw] = (acc + b_ref[...]).astype(out_ref.dtype)


def _spike_kernel(x_ref, w_ref, b_ref, mem_ref, spk_ref,
                  spike_ref, mem_out_ref, spk_out_ref, *,
                  kh, kw, w_dim, pad, hw, l_img, g_imgs):
    # spike branch: x = conv(input); mem += x; spike = (mem>=th)*th;
    # spikes += (mem>=th); mem -= spike; return spike
    cout = mem_ref.shape[0]
    col = lax.broadcasted_iota(jnp.int32, (1, hw), 1) % w_dim
    for g in range(g_imgs):
        sl = slice(g * hw, (g + 1) * hw)
        x = _conv_image(x_ref, w_ref, col, g * l_img,
                        kh=kh, kw=kw, w_dim=w_dim, pad=pad, hw=hw,
                        cout=cout) + b_ref[...]
        mem = mem_ref[:, sl] + x
        fired = (mem >= THRESHOLD).astype(jnp.float32)
        spike = fired * THRESHOLD
        spike_ref[:, sl] = spike.astype(spike_ref.dtype)
        mem_out_ref[:, sl] = mem - spike
        spk_out_ref[:, sl] = spk_ref[:, sl] + fired


# ---------------------------------------------------------------------------
# pallas_call wrappers
# ---------------------------------------------------------------------------
def _pallas_ann(xh, w_r, b_c1, *, kh, kw, w_dim, pad, hw, l_img, g_imgs):
    cin = xh.shape[0]
    kk, cout, _ = w_r.shape
    n_steps = xh.shape[1] // (g_imgs * l_img)
    m = n_steps * g_imgs * hw
    kernel = functools.partial(_ann_kernel, kh=kh, kw=kw, w_dim=w_dim, pad=pad,
                               hw=hw, l_img=l_img, g_imgs=g_imgs)
    per_step = (cin * g_imgs * l_img * xh.dtype.itemsize
                + w_r.size * w_r.dtype.itemsize + cout * 4
                + cout * g_imgs * hw * 4)
    return pl.pallas_call(
        kernel,
        out_shape=jax.ShapeDtypeStruct((cout, m), jnp.float32),
        grid_spec=pltpu.PrefetchScalarGridSpec(
            num_scalar_prefetch=0,
            grid=(n_steps,),
            in_specs=[pl.BlockSpec((cin, g_imgs * l_img), lambda i: (0, i)),
                      pl.BlockSpec((kk, cout, cin), lambda i: (0, 0, 0)),
                      pl.BlockSpec((cout, 1), lambda i: (0, 0))],
            out_specs=pl.BlockSpec((cout, g_imgs * hw), lambda i: (0, i))),
        compiler_params=_compiler_params(per_step),
    )(xh, w_r, b_c1)


def _pallas_spike(xh, w_r, b_c1, mem_km, spk_km, *,
                  kh, kw, w_dim, pad, hw, l_img, g_imgs):
    cin = xh.shape[0]
    kk, cout, _ = w_r.shape
    n_steps = xh.shape[1] // (g_imgs * l_img)
    m = mem_km.shape[1]
    kernel = functools.partial(_spike_kernel, kh=kh, kw=kw, w_dim=w_dim,
                               pad=pad, hw=hw, l_img=l_img, g_imgs=g_imgs)
    state = pl.BlockSpec((cout, g_imgs * hw), lambda i: (0, i))
    per_step = (cin * g_imgs * l_img * xh.dtype.itemsize
                + w_r.size * w_r.dtype.itemsize + cout * 4
                + 5 * cout * g_imgs * hw * 4)
    return pl.pallas_call(
        kernel,
        out_shape=(jax.ShapeDtypeStruct((cout, m), jnp.bfloat16),   # spike
                   jax.ShapeDtypeStruct((cout, m), jnp.float32),    # mem_pot
                   jax.ShapeDtypeStruct((cout, m), jnp.float32)),   # spike cnt
        grid_spec=pltpu.PrefetchScalarGridSpec(
            num_scalar_prefetch=0,
            grid=(n_steps,),
            in_specs=[pl.BlockSpec((cin, g_imgs * l_img), lambda i: (0, i)),
                      pl.BlockSpec((kk, cout, cin), lambda i: (0, 0, 0)),
                      pl.BlockSpec((cout, 1), lambda i: (0, 0)),
                      state, state],
            out_specs=(state, state, state)),
        # NOTE: positional over the full operand list; keep in sync if scalar
        # prefetch operands are ever added (num_scalar_prefetch > 0).
        input_output_aliases={3: 1, 4: 2},
        compiler_params=_compiler_params(per_step),
    )(xh, w_r, b_c1, mem_km, spk_km)


# ---------------------------------------------------------------------------
# JAX glue (input layout prep, state layout conversion)
# ---------------------------------------------------------------------------
def _prep_input(x, *, pad, hp, l_img, dtype):
    """(N, Cin, H, W) -> (Cin, N*l_img): per image, (pad+1) zero rows above and
    below, row-major flattened, zero-tailed to the 128-aligned length l_img."""
    n, c, h, w = x.shape
    xt = jnp.transpose(x, (1, 0, 2, 3)).astype(dtype)          # (Cin,N,H,W)
    xt = jnp.pad(xt, ((0, 0), (0, 0), (pad + 1, hp - h - pad - 1), (0, 0)))
    xt = xt.reshape(c, n, hp * w)
    if l_img != hp * w:
        xt = jnp.pad(xt, ((0, 0), (0, 0), (0, l_img - hp * w)))
    return xt.reshape(c, n * l_img)


def _cm_to_nchw(t, n, h, w):
    co = t.shape[0]
    return t.reshape(co, n, h, w).transpose(1, 0, 2, 3).astype(jnp.float32)


def _nchw_to_cm(t):
    n, co, h, w = t.shape
    return jnp.asarray(t, jnp.float32).transpose(1, 0, 2, 3).reshape(co, n * h * w)


# ---------------------------------------------------------------------------
# jitted forwards (fuse layout prep around the pallas call; donate state)
# ---------------------------------------------------------------------------
@functools.partial(jax.jit,
                   static_argnames=("kh", "kw", "pad", "h_out", "hp",
                                    "l_img", "g_imgs"))
def _ann_forward(x, w_r, b_c1, *, kh, kw, pad, h_out, hp, l_img, g_imgs):
    n, _, h, w = x.shape
    xh = _prep_input(x, pad=pad, hp=hp, l_img=l_img, dtype=w_r.dtype)
    out = _pallas_ann(xh, w_r, b_c1, kh=kh, kw=kw, w_dim=w, pad=pad,
                      hw=h_out * w, l_img=l_img, g_imgs=g_imgs)
    return _cm_to_nchw(out, n, h_out, w)


@functools.partial(jax.jit,
                   static_argnames=("kh", "kw", "pad", "h_out", "hp",
                                    "l_img", "g_imgs"),
                   donate_argnums=(3, 4))
def _spike_forward(x, w_r, b_c1, mem_km, spk_km, *,
                   kh, kw, pad, h_out, hp, l_img, g_imgs):
    n, _, h, w = x.shape
    xh = _prep_input(x, pad=pad, hp=hp, l_img=l_img, dtype=w_r.dtype)
    spike_km, mem_out, spk_out = _pallas_spike(
        xh, w_r, b_c1, mem_km, spk_km, kh=kh, kw=kw, w_dim=w, pad=pad,
        hw=h_out * w, l_img=l_img, g_imgs=g_imgs)
    return _cm_to_nchw(spike_km, n, h_out, w), mem_out, spk_out


# ---------------------------------------------------------------------------
# SpikeModule port (Conv2d flavor, stride=1, dilation=1, groups=1)
# ---------------------------------------------------------------------------
class SpikeModule:
    def __init__(self, sim_length, weight, bias, padding=1, enable_shift=True,
                 compute_dtype=jnp.bfloat16):
        self.threshold = THRESHOLD
        self.mem_pot_init = 0
        self.weight = weight
        self.org_weight = jnp.array(weight)          # deepcopy equivalent
        self.bias = bias
        self.org_bias = None if bias is None else jnp.array(bias)
        self.padding = int(padding)
        self.use_spike = False
        self.enable_shift = enable_shift  # TODO(synk): unused in the reference forward
        self.sim_length = sim_length
        self.cur_t = 0
        self.shift = 0.0

        cout, cin, kh, kw = weight.shape
        if kw != 2 * self.padding + 1:
            # TODO(synk): general (non-'same'-width) padding needs a different
            #             input layout for the shifted-slice conv.
            raise ValueError("kernel requires KW == 2*padding + 1")
        self._co, self._ci, self._kh, self._kw = cout, cin, kh, kw
        self._compute_dtype = compute_dtype

        # cached GEMM-layout weights / bias (weights assumed frozen during
        # inference); weights in bf16, bias in f32.
        def w_gemm(wt):
            return (jnp.asarray(wt, jnp.float32)
                    .transpose(2, 3, 0, 1)
                    .reshape(kh * kw, cout, cin)
                    .astype(compute_dtype))

        self._w_r = w_gemm(weight)
        self._org_w_r = w_gemm(self.org_weight)
        b = jnp.zeros((cout,), jnp.float32) if bias is None \
            else jnp.asarray(bias, jnp.float32)
        ob = jnp.zeros((cout,), jnp.float32) if self.org_bias is None \
            else jnp.asarray(self.org_bias, jnp.float32)
        self._b_c1 = b.reshape(cout, 1)
        self._org_b_c1 = ob.reshape(cout, 1)

        # state kept in lane-dense kernel layout (Cout, M) across timesteps;
        # converted to NCHW only when mem_pot / spikes are read.
        self._mem_km = None
        self._spk_km = None
        self._mem_scalar = 0.0
        self._spk_scalar = 0.0
        self._shape_info = None      # (n, h_out, w)

    # -- user-facing state (NCHW, like the PyTorch module) ------------------
    @property
    def mem_pot(self):
        if self._mem_km is None:
            return self._mem_scalar
        n, h, w = self._shape_info
        return _cm_to_nchw(self._mem_km, n, h, w)

    @mem_pot.setter
    def mem_pot(self, value):
        if value is None or jnp.ndim(value) == 0:
            self._mem_scalar = value
            self._mem_km = None
        else:
            n, _, h, w = value.shape
            self._mem_km = _nchw_to_cm(value)
            self._shape_info = (n, h, w)

    @property
    def spikes(self):
        if self._spk_km is None:
            return self._spk_scalar
        n, h, w = self._shape_info
        return _cm_to_nchw(self._spk_km, n, h, w)

    @spikes.setter
    def spikes(self, value):
        if value is None or jnp.ndim(value) == 0:
            self._spk_scalar = value
            self._spk_km = None
        else:
            n, _, h, w = value.shape
            self._spk_km = _nchw_to_cm(value)
            self._shape_info = (n, h, w)

    def init_membrane_potential(self):
        self.mem_pot = self.mem_pot_init
        self.mem_pot = self.mem_pot + self.threshold / 2.0 / self.sim_length
        self.cur_t = 0

    def forward(self, x):
        n, cin, h, w = x.shape
        pad, kh, kw = self.padding, self._kh, self._kw
        co = self._co
        h_out = h + 2 * pad - kh + 1
        hw = h_out * w
        m = n * hw
        hp = h + 2 * (pad + 1)
        l_img = _round_up(hp * w, 128)
        g_imgs = _choose_group(n, hw)
        static = dict(kh=kh, kw=kw, pad=pad, h_out=h_out, hp=hp,
                      l_img=l_img, g_imgs=g_imgs)

        if self.use_spike:
            # materialize state in kernel layout if still scalar / shape changed
            if self._mem_km is None or self._mem_km.shape != (co, m):
                self._mem_km = jnp.full((co, m), self._mem_scalar, jnp.float32)
            if self.cur_t == 0 or self._spk_km is None \
                    or self._spk_km.shape != (co, m):
                self._spk_km = jnp.zeros((co, m), jnp.float32)
            self._shape_info = (n, h_out, w)
            self.cur_t += 1
            spike, self._mem_km, self._spk_km = _spike_forward(
                x, self._w_r, self._b_c1, self._mem_km, self._spk_km, **static)
            return spike
        else:
            # StraightThrough(relu) == identity
            return _ann_forward(x, self._org_w_r, self._org_b_c1, **static)

    __call__ = forward


# ---------------------------------------------------------------------------
if __name__ == "__main__":
    key = jax.random.PRNGKey(0)
    kw_k, kb_k, kx_k = jax.random.split(key, 3)

    N, Cin, H, W = 2, 4, 16, 16
    Cout, KH, KW = 8, 3, 3
    sim_length = 8

    weight = jax.random.normal(kw_k, (Cout, Cin, KH, KW), jnp.float32) * 0.1
    bias = jax.random.normal(kb_k, (Cout,), jnp.float32) * 0.1
    x = jax.random.normal(kx_k, (N, Cin, H, W), jnp.float32)

    mod = SpikeModule(sim_length=sim_length, weight=weight, bias=bias, padding=1)

    # matching-precision reference: bf16 operands, f32 accumulation (the
    # kernel's GEMMs use bf16 operands with f32 MXU accumulation)
    conv_ref = lax.conv_general_dilated(
        x.astype(jnp.bfloat16), weight.astype(jnp.bfloat16),
        window_strides=(1, 1), padding=((1, 1), (1, 1)),
        dimension_numbers=("NCHW", "OIHW", "NCHW"),
        preferred_element_type=jnp.float32) + bias.reshape(1, Cout, 1, 1)

    # --- non-spike (ANN) path: conv + identity ------------------------------
    y_ann = jax.block_until_ready(mod.forward(x))
    assert y_ann.shape == (N, Cout, H, W)
    assert jnp.allclose(y_ann, conv_ref, atol=2e-3, rtol=2e-3), "ANN-mode mismatch"

    # --- spike path: two timesteps of membrane-potential dynamics -----------
    mod.use_spike = True
    mod.init_membrane_potential()

    mem_ref = jnp.full((N, Cout, H, W), THRESHOLD / 2.0 / sim_length, jnp.float32)
    spikes_ref = jnp.zeros((N, Cout, H, W), jnp.float32)
    spike = None
    for _ in range(2):
        spike = mod.forward(x)
        # pure-JAX reference of the same update
        mem_pre = mem_ref + conv_ref
        fired = (mem_pre >= THRESHOLD).astype(jnp.float32)
        spk_ref_t = fired * THRESHOLD
        spikes_ref = spikes_ref + fired
        mem_ref = mem_pre - spk_ref_t
        # allow mismatch only where the membrane sits numerically on threshold
        near = jnp.abs(mem_pre - THRESHOLD) < 1e-3
        assert bool(jnp.all((spike == spk_ref_t) | near)), "spike-mode mismatch"

    spike = jax.block_until_ready(spike)
    mem_out = jax.block_until_ready(mod.mem_pot)
    spk_out = jax.block_until_ready(mod.spikes)

    assert spike.shape == (N, Cout, H, W)
    assert bool(jnp.all(jnp.isfinite(spike)))
    assert bool(jnp.all((spike == 0.0) | (spike == THRESHOLD)))
    assert mem_out.shape == (N, Cout, H, W) and bool(jnp.all(jnp.isfinite(mem_out)))
    assert spk_out.shape == (N, Cout, H, W)
    assert bool(jnp.all((spk_out >= 0.0) & (spk_out <= 2.0)))

    print("KERNEL_OK")
</pallas_src>

<mosaic_0001>
module attributes {stable_mosaic.version = 11 : i64} {
  func.func @_ann_kernel(%arg0: i32, %arg1: memref<4x384xbf16, #tpu.memory_space<vmem>>, %arg2: memref<9x8x4xbf16, #tpu.memory_space<vmem>>, %arg3: memref<8x1xf32, #tpu.memory_space<vmem>>, %arg4: memref<8x256xf32, #tpu.memory_space<vmem>>) attributes {dimension_semantics = [#tpu.dimension_semantics<parallel>], iteration_bounds = array<i64: 2>, scalar_prefetch = 0 : i64, scratch_operands = 0 : i64, tpu.core_type = #tpu.core_type<tc>, window_params = [{transform_indices = @transform_0, window_bounds = array<i64: 4, 384>}, {pipeline_mode = #tpu.pipeline_mode<synchronous>, transform_indices = @transform_1, window_bounds = array<i64: 9, 8, 4>}, {pipeline_mode = #tpu.pipeline_mode<synchronous>, transform_indices = @transform_2, window_bounds = array<i64: 8, 1>}, {transform_indices = @transform_3, window_bounds = array<i64: 8, 256>}]} {
    %0 = tpu.iota {dimensions = array<i32: 1>} : vector<1x256xi32>
    %c16_i32 = arith.constant 16 : i32
    %c0_i32 = arith.constant 0 : i32
    %1 = arith.cmpi eq, %c16_i32, %c0_i32 : i32
    %c1_i32 = arith.constant 1 : i32
    %2 = arith.select %1, %c1_i32, %c16_i32 : i32
    %3 = vector.broadcast %2 : i32 to vector<1x256xi32>
    %4 = arith.remsi %0, %3 : vector<1x256xi32>
    %c0_i32_0 = arith.constant 0 : i32
    %5 = vector.broadcast %c0_i32_0 : i32 to vector<1x256xi32>
    %6 = arith.cmpi ne, %4, %5 : vector<1x256xi32>
    %c0_i32_1 = arith.constant 0 : i32
    %7 = vector.broadcast %c0_i32_1 : i32 to vector<1x256xi32>
    %8 = arith.cmpi slt, %4, %7 : vector<1x256xi32>
    %c0_i32_2 = arith.constant 0 : i32
    %9 = arith.cmpi slt, %2, %c0_i32_2 : i32
    %10 = vector.broadcast %9 : i1 to vector<1x256xi1>
    %11 = vector.broadcast %10 : vector<1x256xi1> to vector<1x256xi1>
    %12 = arith.xori %8, %11 : vector<1x256xi1>
    %13 = arith.andi %12, %6 : vector<1x256xi1>
    %14 = vector.broadcast %2 : i32 to vector<1x256xi32>
    %15 = arith.addi %4, %14 : vector<1x256xi32>
    %16 = arith.select %13, %15, %4 : vector<1x256xi1>, vector<1x256xi32>
    %cst = arith.constant 0.000000e+00 : f32
    %17 = vector.broadcast %cst : f32 to vector<8x256xf32>
    %cst_3 = arith.constant 0.000000e+00 : f32
    %18 = vector.broadcast %cst_3 : f32 to vector<8x256xf32>
    %c0 = arith.constant 0 : index
    %c15 = arith.constant 15 : index
    %19 = vector.load %arg1[%c0, %c15] : memref<4x384xbf16, #tpu.memory_space<vmem>>, vector<4x256xbf16>
    %c0_4 = arith.constant 0 : index
    %c0_5 = arith.constant 0 : index
    %c0_6 = arith.constant 0 : index
    %20 = vector.load %arg2[%c0_4, %c0_5, %c0_6] : memref<9x8x4xbf16, #tpu.memory_space<vmem>>, vector<1x8x4xbf16>
    %21 = vector.shape_cast %20 : vector<1x8x4xbf16> to vector<8x4xbf16>
    %cst_7 = arith.constant dense<0.000000e+00> : vector<8x256xf32>
    %22 = tpu.matmul %21, %19, %cst_7 {dimension_numbers = #tpu.dot_dimension_numbers<[1], [0], [0], [1], [0, 0, 1, 1], [], []>} : vector<8x4xbf16>, vector<4x256xbf16>, vector<8x256xf32> -> vector<8x256xf32>
    %23 = arith.addf %18, %22 : vector<8x256xf32>
    %c0_8 = arith.constant 0 : index
    %c31 = arith.constant 31 : index
    %24 = vector.load %arg1[%c0_8, %c31] : memref<4x384xbf16, #tpu.memory_space<vmem>>, vector<4x256xbf16>
    %c3 = arith.constant 3 : index
    %c0_9 = arith.constant 0 : index
    %c0_10 = arith.constant 0 : index
    %25 = vector.load %arg2[%c3, %c0_9, %c0_10] : memref<9x8x4xbf16, #tpu.memory_space<vmem>>, vector<1x8x4xbf16>
    %26 = vector.shape_cast %25 : vector<1x8x4xbf16> to vector<8x4xbf16>
    %cst_11 = arith.constant dense<0.000000e+00> : vector<8x256xf32>
    %27 = tpu.matmul %26, %24, %cst_11 {dimension_numbers = #tpu.dot_dimension_numbers<[1], [0], [0], [1], [0, 0, 1, 1], [], []>} : vector<8x4xbf16>, vector<4x256xbf16>, vector<8x256xf32> -> vector<8x256xf32>
    %28 = arith.addf %23, %27 : vector<8x256xf32>
    %c0_12 = arith.constant 0 : index
    %c47 = arith.constant 47 : index
    %29 = vector.load %arg1[%c0_12, %c47] : memref<4x384xbf16, #tpu.memory_space<vmem>>, vector<4x256xbf16>
    %c6 = arith.constant 6 : index
    %c0_13 = arith.constant 0 : index
    %c0_14 = arith.constant 0 : index
    %30 = vector.load %arg2[%c6, %c0_13, %c0_14] : memref<9x8x4xbf16, #tpu.memory_space<vmem>>, vector<1x8x4xbf16>
    %31 = vector.shape_cast %30 : vector<1x8x4xbf16> to vector<8x4xbf16>
    %cst_15 = arith.constant dense<0.000000e+00> : vector<8x256xf32>
    %32 = tpu.matmul %31, %29, %cst_15 {dimension_numbers = #tpu.dot_dimension_numbers<[1], [0], [0], [1], [0, 0, 1, 1], [], []>} : vector<8x4xbf16>, vector<4x256xbf16>, vector<8x256xf32> -> vector<8x256xf32>
    %33 = arith.addf %28, %32 : vector<8x256xf32>
    %c-1_i32 = arith.constant -1 : i32
    %34 = vector.broadcast %c-1_i32 : i32 to vector<1x256xi32>
    %35 = arith.addi %16, %34 : vector<1x256xi32>
    %c0_i32_16 = arith.constant 0 : i32
    %36 = vector.broadcast %c0_i32_16 : i32 to vector<1x256xi32>
    %37 = arith.cmpi sge, %35, %36 : vector<1x256xi32>
    %c-1_i32_17 = arith.constant -1 : i32
    %38 = vector.broadcast %c-1_i32_17 : i32 to vector<1x256xi32>
    %39 = arith.addi %16, %38 : vector<1x256xi32>
    %c16_i32_18 = arith.constant 16 : i32
    %40 = vector.broadcast %c16_i32_18 : i32 to vector<1x256xi32>
    %41 = arith.cmpi slt, %39, %40 : vector<1x256xi32>
    %42 = arith.andi %37, %41 : vector<1x256xi1>
    %cst_19 = arith.constant 0.000000e+00 : f32
    %43 = vector.shape_cast %42 : vector<1x256xi1> to vector<1x256xi1>
    %44 = vector.broadcast %43 : vector<1x256xi1> to vector<8x256xi1>
    %45 = vector.broadcast %cst_19 : f32 to vector<8x256xf32>
    %46 = arith.select %44, %33, %45 : vector<8x256xi1>, vector<8x256xf32>
    %47 = arith.addf %17, %46 : vector<8x256xf32>
    %cst_20 = arith.constant 0.000000e+00 : f32
    %48 = vector.broadcast %cst_20 : f32 to vector<8x256xf32>
    %c0_21 = arith.constant 0 : index
    %c16 = arith.constant 16 : index
    %49 = vector.load %arg1[%c0_21, %c16] : memref<4x384xbf16, #tpu.memory_space<vmem>>, vector<4x256xbf16>
    %c1 = arith.constant 1 : index
    %c0_22 = arith.constant 0 : index
    %c0_23 = arith.constant 0 : index
    %50 = vector.load %arg2[%c1, %c0_22, %c0_23] : memref<9x8x4xbf16, #tpu.memory_space<vmem>>, vector<1x8x4xbf16>
    %51 = vector.shape_cast %50 : vector<1x8x4xbf16> to vector<8x4xbf16>
    %cst_24 = arith.constant dense<0.000000e+00> : vector<8x256xf32>
    %52 = tpu.matmul %51, %49, %cst_24 {dimension_numbers = #tpu.dot_dimension_numbers<[1], [0], [0], [1], [0, 0, 1, 1], [], []>} : vector<8x4xbf16>, vector<4x256xbf16>, vector<8x256xf32> -> vector<8x256xf32>
    %53 = arith.addf %48, %52 : vector<8x256xf32>
    %c0_25 = arith.constant 0 : index
    %c32 = arith.constant 32 : index
    %54 = vector.load %arg1[%c0_25, %c32] : memref<4x384xbf16, #tpu.memory_space<vmem>>, vector<4x256xbf16>
    %c4 = arith.constant 4 : index
    %c0_26 = arith.constant 0 : index
    %c0_27 = arith.constant 0 : index
    %55 = vector.load %arg2[%c4, %c0_26, %c0_27] : memref<9x8x4xbf16, #tpu.memory_space<vmem>>, vector<1x8x4xbf16>
    %56 = vector.shape_cast %55 : vector<1x8x4xbf16> to vector<8x4xbf16>
    %cst_28 = arith.constant dense<0.000000e+00> : vector<8x256xf32>
    %57 = tpu.matmul %56, %54, %cst_28 {dimension_numbers = #tpu.dot_dimension_numbers<[1], [0], [0], [1], [0, 0, 1, 1], [], []>} : vector<8x4xbf16>, vector<4x256xbf16>, vector<8x256xf32> -> vector<8x256xf32>
    %58 = arith.addf %53, %57 : vector<8x256xf32>
    %c0_29 = arith.constant 0 : index
    %c48 = arith.constant 48 : index
    %59 = vector.load %arg1[%c0_29, %c48] : memref<4x384xbf16, #tpu.memory_space<vmem>>, vector<4x256xbf16>
    %c7 = arith.constant 7 : index
    %c0_30 = arith.constant 0 : index
    %c0_31 = arith.constant 0 : index
    %60 = vector.load %arg2[%c7, %c0_30, %c0_31] : memref<9x8x4xbf16, #tpu.memory_space<vmem>>, vector<1x8x4xbf16>
    %61 = vector.shape_cast %60 : vector<1x8x4xbf16> to vector<8x4xbf16>
    %cst_32 = arith.constant dense<0.000000e+00> : vector<8x256xf32>
    %62 = tpu.matmul %61, %59, %cst_32 {dimension_numbers = #tpu.dot_dimension_numbers<[1], [0], [0], [1], [0, 0, 1, 1], [], []>} : vector<8x4xbf16>, vector<4x256xbf16>, vector<8x256xf32> -> vector<8x256xf32>
    %63 = arith.addf %58, %62 : vector<8x256xf32>
    %64 = arith.addf %47, %63 : vector<8x256xf32>
    %cst_33 = arith.constant 0.000000e+00 : f32
    %65 = vector.broadcast %cst_33 : f32 to vector<8x256xf32>
    %c0_34 = arith.constant 0 : index
    %c17 = arith.constant 17 : index
    %66 = vector.load %arg1[%c0_34, %c17] : memref<4x384xbf16, #tpu.memory_space<vmem>>, vector<4x256xbf16>
    %c2 = arith.constant 2 : index
    %c0_35 = arith.constant 0 : index
    %c0_36 = arith.constant 0 : index
    %67 = vector.load %arg2[%c2, %c0_35, %c0_36] : memref<9x8x4xbf16, #tpu.memory_space<vmem>>, vector<1x8x4xbf16>
    %68 = vector.shape_cast %67 : vector<1x8x4xbf16> to vector<8x4xbf16>
    %cst_37 = arith.constant dense<0.000000e+00> : vector<8x256xf32>
    %69 = tpu.matmul %68, %66, %cst_37 {dimension_numbers = #tpu.dot_dimension_numbers<[1], [0], [0], [1], [0, 0, 1, 1], [], []>} : vector<8x4xbf16>, vector<4x256xbf16>, vector<8x256xf32> -> vector<8x256xf32>
    %70 = arith.addf %65, %69 : vector<8x256xf32>
    %c0_38 = arith.constant 0 : index
    %c33 = arith.constant 33 : index
    %71 = vector.load %arg1[%c0_38, %c33] : memref<4x384xbf16, #tpu.memory_space<vmem>>, vector<4x256xbf16>
    %c5 = arith.constant 5 : index
    %c0_39 = arith.constant 0 : index
    %c0_40 = arith.constant 0 : index
    %72 = vector.load %arg2[%c5, %c0_39, %c0_40] : memref<9x8x4xbf16, #tpu.memory_space<vmem>>, vector<1x8x4xbf16>
    %73 = vector.shape_cast %72 : vector<1x8x4xbf16> to vector<8x4xbf16>
    %cst_41 = arith.constant dense<0.000000e+00> : vector<8x256xf32>
    %74 = tpu.matmul %73, %71, %cst_41 {dimension_numbers = #tpu.dot_dimension_numbers<[1], [0], [0], [1], [0, 0, 1, 1], [], []>} : vector<8x4xbf16>, vector<4x256xbf16>, vector<8x256xf32> -> vector<8x256xf32>
    %75 = arith.addf %70, %74 : vector<8x256xf32>
    %c0_42 = arith.constant 0 : index
    %c49 = arith.constant 49 : index
    %76 = vector.load %arg1[%c0_42, %c49] : memref<4x384xbf16, #tpu.memory_space<vmem>>, vector<4x256xbf16>
    %c8 = arith.constant 8 : index
    %c0_43 = arith.constant 0 : index
    %c0_44 = arith.constant 0 : index
    %77 = vector.load %arg2[%c8, %c0_43, %c0_44] : memref<9x8x4xbf16, #tpu.memory_space<vmem>>, vector<1x8x4xbf16>
    %78 = vector.shape_cast %77 : vector<1x8x4xbf16> to vector<8x4xbf16>
    %cst_45 = arith.constant dense<0.000000e+00> : vector<8x256xf32>
    %79 = tpu.matmul %78, %76, %cst_45 {dimension_numbers = #tpu.dot_dimension_numbers<[1], [0], [0], [1], [0, 0, 1, 1], [], []>} : vector<8x4xbf16>, vector<4x256xbf16>, vector<8x256xf32> -> vector<8x256xf32>
    %80 = arith.addf %75, %79 : vector<8x256xf32>
    %c1_i32_46 = arith.constant 1 : i32
    %81 = vector.broadcast %c1_i32_46 : i32 to vector<1x256xi32>
    %82 = arith.addi %16, %81 : vector<1x256xi32>
    %c0_i32_47 = arith.constant 0 : i32
    %83 = vector.broadcast %c0_i32_47 : i32 to vector<1x256xi32>
    %84 = arith.cmpi sge, %82, %83 : vector<1x256xi32>
    %c1_i32_48 = arith.constant 1 : i32
    %85 = vector.broadcast %c1_i32_48 : i32 to vector<1x256xi32>
    %86 = arith.addi %16, %85 : vector<1x256xi32>
    %c16_i32_49 = arith.constant 16 : i32
    %87 = vector.broadcast %c16_i32_49 : i32 to vector<1x256xi32>
    %88 = arith.cmpi slt, %86, %87 : vector<1x256xi32>
    %89 = arith.andi %84, %88 : vector<1x256xi1>
    %cst_50 = arith.constant 0.000000e+00 : f32
    %90 = vector.shape_cast %89 : vector<1x256xi1> to vector<1x256xi1>
    %91 = vector.broadcast %90 : vector<1x256xi1> to vector<8x256xi1>
    %92 = vector.broadcast %cst_50 : f32 to vector<8x256xf32>
    %93 = arith.select %91, %80, %92 : vector<8x256xi1>, vector<8x256xf32>
    %94 = arith.addf %64, %93 : vector<8x256xf32>
    %c0_51 = arith.constant 0 : index
    %c0_52 = arith.constant 0 : index
    %95 = vector.load %arg3[%c0_51, %c0_52] : memref<8x1xf32, #tpu.memory_space<vmem>>, vector<8x1xf32>
    %96 = vector.broadcast %95 : vector<8x1xf32> to vector<8x256xf32>
    %97 = arith.addf %94, %96 : vector<8x256xf32>
    %c0_53 = arith.constant 0 : index
    %c0_54 = arith.constant 0 : index
    %98 = vector.load %arg4[%c0_53, %c0_54] : memref<8x256xf32, #tpu.memory_space<vmem>>, vector<8x256xf32>
    tpu.vector_store %arg4[%c0_53, %c0_54], %97 {strides = array<i32>} : memref<8x256xf32, #tpu.memory_space<vmem>>, vector<8x256xf32>,
    return
  }
  func.func @transform_0(%arg0: i32) -> (i32, i32) {
    %c0_i32 = arith.constant 0 : i32
    %c0_i32_0 = arith.constant 0 : i32
    return %c0_i32, %arg0 : i32, i32
  }
  func.func @transform_1(%arg0: i32) -> (i32, i32, i32) {
    %c0_i32 = arith.constant 0 : i32
    %c0_i32_0 = arith.constant 0 : i32
    %c0_i32_1 = arith.constant 0 : i32
    %c0_i32_2 = arith.constant 0 : i32
    return %c0_i32, %c0_i32_0, %c0_i32_1 : i32, i32, i32
  }
  func.func @transform_2(%arg0: i32) -> (i32, i32) {
    %c0_i32 = arith.constant 0 : i32
    %c0_i32_0 = arith.constant 0 : i32
    %c0_i32_1 = arith.constant 0 : i32
    return %c0_i32, %c0_i32_0 : i32, i32
  }
  func.func @transform_3(%arg0: i32) -> (i32, i32) {
    %c0_i32 = arith.constant 0 : i32
    %c0_i32_0 = arith.constant 0 : i32
    return %c0_i32, %arg0 : i32, i32
  }
}

</mosaic_0001>

<bundles_post_ra>
// kernel: _ann_forward.1
= control target key start
LH: loop header
LB: loop body
LE: loop exit
PB: predicated region body
PF: predicated region fallthrough
CT: control target
= control target key end

     0   :  { %s1082_s12 = smov 0   ;;  %s1195_s0 = inlined_call_operand.vmem [shape: bf16[4,768], index: 0, kind: input, shape index: {}]   ;;  %s1196_s1 = inlined_call_operand.vmem [shape: bf16[9,8,4], index: 1, kind: input, shape index: {}]   ;;  %s1197_s2 = inlined_call_operand.vmem [shape: f32[8,1], index: 2, kind: input, shape index: {}]   ;;  %s1198_s3 = inlined_call_operand.vmem [shape: f32[8,512], index: 3, kind: output, shape index: {}]  }
   0x1 LB: > { %s966_s13 = sadd.s32 4294967295, %s1049_s12   ;;  %p970_p0 = scmp.ge.s32.totalorder %s1049_s12, 1  ;;  %s1049_s12 = sphi %s1082_s12, %s13_s12  }
   0x2   : > { %p138_p1 = scmp.lt.s32.totalorder %s1049_s12, 3 }
   0x4   : > { %p139_p2 = pnand %p970_p0, %p138_p1 }
   0x5   : > { %s162_s14 = smul.u32 (!%p139_p2), 3, %s966_s13  ;;  %v175_v0 = vlaneseq (!%p139_p2)  ;;  %v1051_v1 = vmov (!%p139_p2), 1983009808   ;;  %s1052_s19 = smov (!%p139_p2), 81   ;;  %v1055_v15 = vmov (!%p139_p2), 0   ;;  %v900_v37 = vld [vmem:[%s1197_s2] sm:$0xff] (!%p139_p2) }
   0x6   : > { %142 = sbr.rel (%p139_p2) target bundleno = 412 (0x19c), region = 32  ;;  %v209_v2 = vunpack.c.l.s4 (!%p139_p2), %v1051_v1  ;;  %s1053_s20 = smov (!%p139_p2), 113   ;;  %334 = vmatprep.mubr.bf16.mxu0 (!%p139_p2), %v1055_v15  ;;  %275 = vmatprep.mubr.bf16.mxu1 (!%p139_p2), %v1055_v15  ;;  %vm290_vm0 = vcmask (!%p139_p2), 924672   ;;  %vm236_vm1 = vcmask (!%p139_p2), 1041408   ;;  %vm369_vm2 = vcmask (!%p139_p2), 662528  }
   0x7   : > { %p163_p3 = scmp.lt.s32.totalorder (!%p139_p2), %s162_s14, 5  ;;  %v212_v3 = vshrl.u32 (!%p139_p2), %v175_v0, 7  ;;  %s1054_s21 = smov (!%p139_p2), 97   ;;  %1035 = vset.pattern.permute.xlu1 (!%p139_p2), %v1055_v15  ;;  %1036 = vset.pattern.permute.xlu0 (!%p139_p2), %v1055_v15  ;;  %v203_v47 = vld [vmem:[%s1196_s1] sm:$0xf] (!%p139_p2)  ;;  %vm232_vm3 = vcmask (!%p139_p2), 31744  }
   0x8   : > { %v210_v4 = vunpack.c.0.s8 (!%p139_p2), %v209_v2  ;;  %s1056_s22 = smov (!%p139_p2), 95   ;;  %s1057_s23 = smov (!%p139_p2), 96   ;;  %vm229_vm4 = vcmask (!%p139_p2), 793600   ;;  %vm691_vm5 = vcmask (!%p139_p2), 777216   ;;  %v974_v58 = vld [vmem:[%s1196_s1 + $0xc] sm:$0xf] (!%p139_p2) }
   0x9   : > { %s1058_s24 = smov (!%p139_p2), 111   ;;  %s1059_s25 = smov (!%p139_p2), 112   ;;  %v979_v63 = vld [vmem:[%s1196_s1 + $0x18] sm:$0xf] (!%p139_p2)  ;;  %vm468_vm6 = vcmask (!%p139_p2), 785408   ;;  %vm750_vm7 = vcmask (!%p139_p2), 908288  }
   0xa   : > { %v1093_v5 = vsub.s32 (!%p139_p2), %v210_v4, %v212_v3  ;;  %s1060_s26 = smov (!%p139_p2), 80   ;;  %s1061_s27 = smov (!%p139_p2), 79   ;;  %vm527_vm8 = vcmask (!%p139_p2), 916480   ;;  %vm606_vm9 = vcmask (!%p139_p2), 654336   ;;  %vm829_vm10 = vcmask (!%p139_p2), 646144  }
   0xd   : > { %s1200_s14 = smov (!%p163_p3, %s162_s14), 5 }
   0xe   : > { %s971_s15 = sshll.u32 %s1200_s14, 1 }
   0xf   : > { %s1098_s18 = scalar_lea.vmem %s1195_s0, %s971_s15 }
  0x10   : > { %v343_v6 = vld [vmem:[%s1098_s18] sm:$0x3f] }
  0x11   : > { %v202_v7 = vld [vmem:[%s1098_s18] sm:$0x3f]  ;;  %v354_v8 = vrot.slane %v343_v6, %v1093_v5  ;;  %v347_v11 = vcombine.high %v343_v6, %v343_v6 }
  0x12   : > { %v214_v9 = vrot.slane %v202_v7, %v1093_v5  ;;  %v207_v10 = vcombine.high %v202_v7, %v202_v7  ;;  %v663_v17 = vld [vmem:[%s1098_s18] sm:$0x3f] }
  0x13   : > { %363 = vrot.lane.b32.xlu1 %v354_v8, %s1052_s19  ;;  %v361_v14 = vrot.slane %v347_v11, %v1093_v5  ;;  %v362_v16 = vcombine.high %v354_v8, %v354_v8  ;;  %v676_v18 = vrot.slane %v663_v17, %v1093_v5  ;;  %v669_v19 = vcombine.high %v663_v17, %v663_v17  ;;  %v440_v20 = vld [vmem:[%s1098_s18] sm:$0x3f] }
  0x14   : > { %284 = vrot.lane.b32.xlu0 %v214_v9, %s1053_s20  ;;  %v221_v12 = vrot.slane %v207_v10, %v1093_v5  ;;  %v222_v13 = vcombine.high %v214_v9, %v214_v9  ;;  %v453_v23 = vrot.slane %v440_v20, %v1093_v5  ;;  %v446_v25 = vcombine.high %v440_v20, %v440_v20  ;;  %v580_v27 = vld [vmem:[%s1098_s18] sm:$0x3f] }
  0x15   : > { %v684_v21 = vcombine.high %v676_v18, %v676_v18  ;;  %v683_v22 = vrot.slane %v669_v19, %v1093_v5  ;;  %v591_v28 = vrot.slane %v580_v27, %v1093_v5  ;;  %v584_v29 = vcombine.high %v580_v27, %v580_v27  ;;  %v803_v30 = vld [vmem:[%s1098_s18] sm:$0x3f]  ;;  %v991_v27 = vld [vmem:[%s1196_s1 + $0x8] sm:$0xf] }
  0x16   : > { %v461_v24 = vcombine.high %v453_v23, %v453_v23  ;;  %v460_v26 = vrot.slane %v446_v25, %v1093_v5  ;;  %v814_v33 = vrot.slane %v803_v30, %v1093_v5  ;;  %v807_v35 = vcombine.high %v803_v30, %v803_v30 }
  0x17   : > { %288 = vrot.lane.b32.xlu1 %v221_v12, %s1053_s20  ;;  %v599_v31 = vcombine.high %v591_v28, %v591_v28  ;;  %v598_v32 = vrot.slane %v584_v29, %v1093_v5 }
  0x18   : > { %223 = vrot.lane.b32.xlu0 %v214_v9, %s1054_s21  ;;  %v822_v34 = vcombine.high %v814_v33, %v814_v33  ;;  %v821_v36 = vrot.slane %v807_v35, %v1093_v5  ;;  %v992_v9 = vld [vmem:[%s1196_s1 + $0x14] sm:$0xf] }
  0x1b   : > { %367 = vrot.lane.b32.xlu1 %v361_v14, %s1052_s19 }
  0x1c   : > { %286 = vrot.lane.b32.xlu0 %v222_v13, %s1053_s20 }
  0x1f   : > { %225 = vrot.lane.b32.xlu1 %v222_v13, %s1054_s21 }
  0x20   : > { %365 = vrot.lane.b32.xlu0 %v362_v16, %s1052_s19 }
  0x23   : > { %685 = vrot.lane.b32.xlu1 %v676_v18, %s1056_s22 }
  0x24   : > { %227 = vrot.lane.b32.xlu0 %v221_v12, %s1054_s21  ;;  %v983_v12 = vld [vmem:[%s1196_s1 + $0x10] sm:$0xf] }
  0x27   : > { %689 = vrot.lane.b32.xlu1 %v683_v22, %s1056_s22 }
  0x28   : > { %687 = vrot.lane.b32.xlu0 %v684_v21, %s1056_s22 }
  0x2b   : > { %464 = vrot.lane.b32.xlu1 %v461_v24, %s1057_s23 }
  0x2c   : > { %462 = vrot.lane.b32.xlu0 %v453_v23, %s1057_s23 }
  0x2f   : > { %744 = vrot.lane.b32.xlu1 %v676_v18, %s1058_s24 }
  0x30   : > { %466 = vrot.lane.b32.xlu0 %v460_v26, %s1057_s23  ;;  %s972_s23 = sshll.u32 %s966_s13, 1 }
  0x31   : > { %p169_p4 = scmp.lt.s32.totalorder %s972_s23, 3 }
  0x33   : > { %748 = vrot.lane.b32.xlu1 %v683_v22, %s1058_s24  ;;  %s1202_s23 = smov (!%p169_p4, %s972_s23), 3 }
  0x34   : > { %746 = vrot.lane.b32.xlu0 %v684_v21, %s1058_s24  ;;  %s973_s13 = sshll.u32 %s1202_s23, 3 }
  0x37   : > { %523 = vrot.lane.b32.xlu1 %v461_v24, %s1059_s25  ;;  %v982_v24 = vld [vmem:[%s1196_s1 + $0x4] sm:$0xf] }
  0x38   : > { %521 = vrot.lane.b32.xlu0 %v453_v23, %s1059_s25 }
  0x3b   : > { %600 = vrot.lane.b32.xlu1 %v591_v28, %s1060_s26 }
  0x3c   : > { %525 = vrot.lane.b32.xlu0 %v460_v26, %s1059_s25 }
  0x3f   : > { %604 = vrot.lane.b32.xlu1 %v598_v32, %s1060_s26 }
  0x40   : > { %602 = vrot.lane.b32.xlu0 %v599_v31, %s1060_s26  ;;  %s172_s26 = scalar_lea.vmem %s1198_s3, %s973_s13 }
  0x43   : > { %825 = vrot.lane.b32.xlu1 %v822_v34, %s1061_s27  ;;  %v988_v34 = vld [vmem:[%s1196_s1 + $0x1c] sm:$0xf] }
  0x44   : > { %823 = vrot.lane.b32.xlu0 %v814_v33, %s1061_s27 }
  0x47   : > { %903 = vperm.xlu1 %1035, %v900_v37  }
  0x48   : > { %827 = vrot.lane.b32.xlu0 %v821_v36, %s1061_s27 }
  0x85   : > { %v364_v38 = vpop.permute.xlu1 %363 }
  0x86   : > { %v285_v39 = vpop.permute.xlu0 %284 }
  0x89   : > { %v289_v41 = vpop.permute.xlu1 %288 }
  0x8a   : > { %v224_v40 = vpop.permute.xlu0 %223 }
  0x8d   : > { %v368_v43 = vpop.permute.xlu1 %367 }
  0x8e   : > { %v287_v42 = vpop.permute.xlu0 %286 }
  0x8f   : > { %v292_v44 = vsel %vm290_vm0, %v287_v42, %v289_v41  ;;  %v291_v45 = vsel %vm290_vm0, %v285_v39, %v287_v42 }
  0x90   : > { %977 = vmatprep.subr.msk.bf16.mxu0 %vm236_vm1, %v292_v44  ;;  %v297_v46 = vsel %vm236_vm1, %v291_v45, 0 }
  0x91   : > { %303 = vmatpush1.bf16.msra.mxu0 %v297_v46  ;;  %v226_v49 = vpop.permute.xlu1 %225 }
  0x92   : > { %v366_v48 = vpop.permute.xlu0 %365  ;;  %v230_v53 = vsel %vm229_vm4, %v224_v40, %v226_v49 }
  0x93   : > { %v370_v50 = vsel %vm369_vm2, %v364_v38, %v366_v48  ;;  %v371_v51 = vsel %vm369_vm2, %v366_v48, %v368_v43  ;;  %v238_v57 = vsel %vm236_vm1, %v230_v53, 0  ;;  %v997_v38 = vld [vmem:[%s1196_s1 + $0x20] sm:$0xf] }
  0x94   : > { %v376_v52 = vsel %vm236_vm1, %v370_v50, 0  ;;  %978 = vmatmul.mubr.msk.bf16.vlgmr.msra.gmra.mrb[0].mxu0 %vm232_vm3, %v203_v47  ;;  %980 = vmatprep.subr.msk.bf16.mxu0 %vm236_vm1, %v371_v51  ;;  %v176_v51 = vand.u32 127, %v175_v0 }
  0x95   : > { %382 = vmatpush1.bf16.msra.mxu0 %v376_v52  ;;  %413 = vmatprep.mubr.bf16.mxu0 %v1055_v15  ;;  %v686_v55 = vpop.permute.xlu1 %685 }
  0x96   : > { %v228_v54 = vpop.permute.xlu0 %227  ;;  %v177_v53 = vadd.s32 128, %v176_v51 }
  0x97   : > { %v231_v56 = vsel %vm229_vm4, %v226_v49, %v228_v54  ;;  %v182_v54 = vand.u32 15, %v176_v51 }
  0x98   : > { %975 = vmatprep.subr.msk.bf16.mxu1 %vm236_vm1, %v231_v56 }
  0x99   : > { %244 = vmatpush1.bf16.msra.mxu1 %v238_v57  ;;  %v690_v60 = vpop.permute.xlu1 %689 }
  0x9a   : > { %v688_v59 = vpop.permute.xlu0 %687 }
  0x9b   : > { %v693_v61 = vsel %vm691_vm5, %v688_v59, %v690_v60  ;;  %v692_v62 = vsel %vm691_vm5, %v686_v55, %v688_v59  ;;  %v189_v55 = vand.u32 15, %v177_v53 }
  0x9c   : > { %993 = vmatprep.subr.msk.bf16.mxu0 %vm236_vm1, %v693_v61  ;;  %976 = vmatmul.mubr.msk.bf16.vlgmr.msra.gmra.mrb[0].mxu1 %vm232_vm3, %v974_v58  ;;  %v698_v3 = vsel %vm236_vm1, %v692_v62, 0  ;;  %v424_v61 = vadd.s32 4294967295, %v182_v54 }
  0x9d   : > { %512 = vmatprep.mubr.bf16.mxu1 %v1055_v15  ;;  %v465_v2 = vpop.permute.xlu1 %464  ;;  %v885_v0 = vadd.s32 1, %v189_v55 }
  0x9e   : > { %v463_v1 = vpop.permute.xlu0 %462  ;;  %vm426_vm11 = vcmp.ge.s32.totalorder %v424_v61, 0 }
  0x9f   : > { %v469_v4 = vsel %vm468_vm6, %v463_v1, %v465_v2  ;;  %v884_v1 = vadd.s32 1, %v182_v54  ;;  %vm889_vm14 = vcmp.lt.s32.totalorder %v885_v0, 16 }
  0xa0   : > { %981 = vmatmul.mubr.msk.bf16.vlgmr.msra.gmra.mrb[0].mxu0 %vm232_vm3, %v979_v63  ;;  %v475_v8 = vsel %vm236_vm1, %v469_v4, 0  ;;  %v425_v63 = vadd.s32 4294967295, %v189_v55 }
  0xa1   : > { %704 = vmatpush1.bf16.msra.mxu0 %v698_v3  ;;  %735 = vmatprep.mubr.bf16.mxu0 %v1055_v15  ;;  %v745_v6 = vpop.permute.xlu1 %744  ;;  %vm888_vm13 = vcmp.lt.s32.totalorder %v884_v1, 16 }
  0xa2   : > { %v467_v5 = vpop.permute.xlu0 %466  ;;  %vm427_vm12 = vcmp.ge.s32.totalorder %v425_v63, 0 }
  0xa3   : > { %v470_v7 = vsel %vm468_vm6, %v465_v2, %v467_v5 }
  0xa4   : > { %984 = vmatprep.subr.msk.bf16.mxu1 %vm236_vm1, %v470_v7 }
  0xa5   : > { %481 = vmatpush1.bf16.msra.mxu1 %v475_v8  ;;  %v749_v11 = vpop.permute.xlu1 %748 }
  0xa6   : > { %v747_v10 = vpop.permute.xlu0 %746 }
  0xa7   : > { %v751_v13 = vsel %vm750_vm7, %v745_v6, %v747_v10  ;;  %v752_v14 = vsel %vm750_vm7, %v747_v10, %v749_v11 }
  0xa8   : > { %v757_v16 = vsel %vm236_vm1, %v751_v13, 0  ;;  %994 = vmatmul.mubr.msk.bf16.vlgmr.msra.gmra.mrb[4].mxu0 %vm232_vm3, %v992_v9  ;;  %995 = vmatprep.subr.msk.bf16.mxu0 %vm236_vm1, %v752_v14 }
  0xa9   : > { %763 = vmatpush1.bf16.msra.mxu0 %v757_v16  ;;  %985 = vmatmul.mubr.msk.bf16.vlgmr.msra.gmra.mrb[4].mxu1 %vm232_vm3, %v983_v12  ;;  %v524_v18 = vpop.permute.xlu1 %523 }
  0xaa   : > { %v522_v17 = vpop.permute.xlu0 %521  ;;  %571 = vmatprep.mubr.bf16.mxu1 %v1055_v15  ;;  %794 = vmatprep.mubr.bf16.mxu0 %v1055_v15 }
  0xab   : > { %v528_v19 = vsel %vm527_vm8, %v522_v17, %v524_v18 }
  0xac   : > { %v534_v23 = vsel %vm236_vm1, %v528_v19, 0 }
  0xad   : > { %v601_v21 = vpop.permute.xlu1 %600 }
  0xae   : > { %v526_v20 = vpop.permute.xlu0 %525 }
  0xaf   : > { %v529_v22 = vsel %vm527_vm8, %v524_v18, %v526_v20 }
  0xb0   : > { %986 = vmatprep.subr.msk.bf16.mxu1 %vm236_vm1, %v529_v22 }
  0xb1   : > { %540 = vmatpush1.bf16.msra.mxu1 %v534_v23  ;;  %v605_v26 = vpop.permute.xlu1 %604 }
  0xb2   : > { %v603_v25 = vpop.permute.xlu0 %602 }
  0xb3   : > { %v607_v28 = vsel %vm606_vm9, %v601_v21, %v603_v25  ;;  %v608_v29 = vsel %vm606_vm9, %v603_v25, %v605_v26 }
  0xb4   : > { %v613_v30 = vsel %vm236_vm1, %v607_v28, 0  ;;  %987 = vmatmul.mubr.msk.bf16.vlgmr.msra.gmra.mrb[8].mxu1 %vm232_vm3, %v982_v24  ;;  %989 = vmatprep.subr.msk.bf16.mxu1 %vm236_vm1, %v608_v29 }
  0xb5   : > { %996 = vmatmul.mubr.msk.bf16.vlgmr.msra.gmra.mrb[4].mxu0 %vm232_vm3, %v991_v27  ;;  %619 = vmatpush1.bf16.msra.mxu1 %v613_v30  ;;  %v826_v32 = vpop.permute.xlu1 %825 }
  0xb6   : > { %v824_v31 = vpop.permute.xlu0 %823  ;;  %650 = vmatprep.mubr.bf16.mxu1 %v1055_v15  ;;  %873 = vmatprep.mubr.bf16.mxu0 %v1055_v15 }
  0xb7   : > { %v830_v33 = vsel %vm829_vm10, %v824_v31, %v826_v32 }
  0xb8   : > { %v836_v37 = vsel %vm236_vm1, %v830_v33, 0 }
  0xba   : > { %v828_v35 = vpop.permute.xlu0 %827 }
  0xbb   : > { %v831_v36 = vsel %vm829_vm10, %v826_v32, %v828_v35 }
  0xbc   : > { %990 = vmatmul.mubr.msk.bf16.vlgmr.msra.gmra.mrb[12].mxu1 %vm232_vm3, %v988_v34  ;;  %998 = vmatprep.subr.msk.bf16.mxu0 %vm236_vm1, %v831_v36 }
  0xbd   : > { %842 = vmatpush1.bf16.msra.mxu0 %v836_v37 }
  0xc1   : > { %999 = vmatmul.mubr.msk.bf16.vlgmr.msra.gmra.mrb[4].mxu0 %vm232_vm3, %v997_v38 }
  0xc6   : > { %v904_v16 = vpop.permute.xlu1 %903 }
 0x16f   : > { %v277_v15 = vpop.f32.mrb[0].mxu1 }
 0x170   : > { %v279_v39 = vpop.f32.mrb[1].mxu1 }
 0x171   : > { %v281_v40 = vpop.f32.mrb[2].mxu1 }
 0x172   : > { %v282_v41 = vpop.f32.mrb[3].mxu1 }
 0x173   : > { %v415_v42 = vpop.f32.mrb[0].mxu0 }
 0x174   : > { %v1002_v43 = vadd.f32 %v415_v42, %v277_v15  ;;  %v417_v44 = vpop.f32.mrb[1].mxu0 }
 0x175   : > { %v1003_v45 = vadd.f32 %v417_v44, %v279_v39  ;;  %v419_v46 = vpop.f32.mrb[2].mxu0 }
 0x176   : > { %v420_v47 = vpop.f32.mrb[3].mxu0  ;;  %v436_v5 = vsel %vm426_vm11, %v1002_v43, 0.0 }
 0x177   : > { %v437_v8 = vsel %vm427_vm12, %v1003_v45, 0.0 }
 0x17c   : > { %v514_v48 = vpop.f32.mrb[4].mxu1 }
 0x17d   : > { %v516_v49 = vpop.f32.mrb[5].mxu1 }
 0x17e   : > { %v518_v50 = vpop.f32.mrb[6].mxu1 }
 0x17f   : > { %v519_v52 = vpop.f32.mrb[7].mxu1 }
 0x187   : > { %v573_v56 = vpop.f32.mrb[8].mxu1 }
 0x188   : > { %v574_v57 = vadd.f32 %v573_v56, %v514_v48  ;;  %v575_v58 = vpop.f32.mrb[9].mxu1 }
 0x189   : > { %v576_v59 = vadd.f32 %v575_v58, %v516_v49  ;;  %v577_v60 = vpop.f32.mrb[10].mxu1 }
 0x18a   : > { %v578_v62 = vpop.f32.mrb[11].mxu1 }
 0x18f   : > { %v652_v2 = vpop.f32.mrb[12].mxu1 }
 0x190   : > { %v659_v3 = vadd.f32 %v652_v2, %v574_v57  ;;  %v654_v4 = vpop.f32.mrb[13].mxu1 }
 0x191   : > { %v660_v6 = vadd.f32 %v654_v4, %v576_v59  ;;  %v656_v7 = vpop.f32.mrb[14].mxu1 }
 0x192   : > { %v661_v9 = vadd.f32 %v659_v3, %v436_v5  ;;  %v657_v10 = vpop.f32.mrb[15].mxu1 }
 0x193   : > { %v662_v11 = vadd.f32 %v660_v6, %v437_v8 }
 0x194   : > { %v875_v12 = vpop.f32.mrb[4].mxu0 }
 0x195   : > { %v896_v13 = vsel %vm888_vm13, %v875_v12, 0.0  ;;  %v877_v14 = vpop.f32.mrb[5].mxu0 }
 0x196   : > { %v898_v17 = vadd.f32 %v896_v13, %v661_v9  ;;  %v897_v18 = vsel %vm889_vm14, %v877_v14, 0.0  ;;  %v879_v19 = vpop.f32.mrb[6].mxu0 }
 0x197   : > { %v899_v20 = vadd.f32 %v897_v18, %v662_v11  ;;  %v880_v21 = vpop.f32.mrb[7].mxu0 }
 0x198   : > { %v906_v22 = vadd.f32 %v904_v16, %v898_v17 }
 0x199   : > { %v907_v23 = vadd.f32 %v904_v16, %v899_v20 }
 0x19a   : > { %908 = vst [vmem:[%s172_s26] sm:$0xff] %v906_v22 }
 0x19b   : > { %909 = vst [vmem:[%s172_s26 + $0x8] sm:$0xff] %v907_v23 }
 0x19c PF: > { %s13_s12 = sadd.s32 1, %s1049_s12  }
 0x19d   : > { %p10_p5 = scmp.ge.s32.totalorder %s13_s12, 4  }
 0x19f   :  { %12 = sbr.rel (!%p10_p5) target bundleno = 1 (0x1), region = 70 }

</bundles_post_ra>
